<compile_context>
chip_gen: v6e
topology: v6e:2x2x1
jax: 0.10.0
libtpu: 0.0.40
codegen_flags: <defaults>
</compile_context>

<pallas_src>
import functools

import jax
import jax.numpy as jnp
from jax.experimental import pallas as pl
from jax.experimental.pallas import tpu as pltpu


def _round_up(x, m):
    return (x + m - 1) // m * m


def _cdiv(a, b):
    return (a + b - 1) // b


def _vmem_capacity_bytes():
    """Physical VMEM per TensorCore; conservative fallback if unknown."""
    try:
        return int(pltpu.get_tpu_info().vmem_capacity_bytes)
    except Exception:
        return 64 << 20  # v7x per-TC budget (most restrictive)


def choose_block_i(hidden_size, intermediate_size, *, w_bytes=2, x_bytes=2,
                   block_tokens=256, vmem_bytes=None):
    """Pick the intermediate tile ti.

    Prefers ti == I (single I block -> weights are DMA'd once and stay
    VMEM-resident across all token tiles, the right choice on v5e/v6e's
    128 MiB VMEM). Otherwise returns the largest lane-aligned divisor of I
    whose double-buffered tiles + intermediates fit the budget (v7x).
    """
    H, I = hidden_size, intermediate_size
    if vmem_bytes is None:
        vmem_bytes = _vmem_capacity_bytes()
    budget = int(vmem_bytes * 0.80)
    tm = block_tokens

    def fits(ti):
        io = 2 * (tm * H * x_bytes          # x tile (double-buffered)
                  + H * 2 * ti * w_bytes    # fused gate/up tile
                  + ti * H * w_bytes        # down tile
                  + tm * H * x_bytes)       # output tile
        acc = tm * H * 4
        inter = tm * 2 * ti * 4 + tm * ti * 4 + tm * ti * w_bytes
        return io + acc + inter + (4 << 20) <= budget

    if fits(I):
        return I
    best = 128
    ti = 128
    while ti < I:
        if I % ti == 0 and fits(ti):
            best = ti
        ti += 128
    return best


def pack_gate_up(w_gate, w_up, block_i):
    """Pack (H, I) gate/up weights into (I // block_i, H, 2 * block_i).

    Leading dim is the I-tile index, so each grid step reads one contiguous
    H x (2*block_i) slab. Done once at weight-load time in production.
    """
    H, I = w_gate.shape
    assert w_up.shape == (H, I)
    assert I % block_i == 0, "intermediate_size must be a multiple of block_i"
    assert block_i % 128 == 0, "block_i must be lane-aligned (multiple of 128)"
    n_i = I // block_i
    g = jnp.transpose(w_gate.reshape(H, n_i, block_i), (1, 0, 2))  # (n_i, H, ti)
    u = jnp.transpose(w_up.reshape(H, n_i, block_i), (1, 0, 2))    # (n_i, H, ti)
    return jnp.concatenate([g, u], axis=-1)                        # (n_i, H, 2*ti)


def _glm4_moe_mlp_kernel(x_ref, wgu_ref, wd_ref, o_ref, acc_ref):
    """One (token tile, I tile) step of the SwiGLU MLP.

    x_ref   : (tm, H)            activations (weight dtype, e.g. bf16)
    wgu_ref : (H, 2*ti)          fused [gate | up] weight tile
    wd_ref  : (ti, H)            down-projection weight tile
    o_ref   : (tm, H)            output tile (written on last I tile)
    acc_ref : (tm, H) f32 VMEM   down_proj accumulator
    """
    j = pl.program_id(1)

    @pl.when(j == 0)
    def _():
        acc_ref[...] = jnp.zeros_like(acc_ref)

    ti = wd_ref.shape[0]
    x = x_ref[...]

    # Fused gate_up_proj for this I tile: one wide MXU matmul, f32 accumulate.
    gu = jnp.dot(x, wgu_ref[...], preferred_element_type=jnp.float32)
    gate = gu[:, :ti]
    up = gu[:, ti:]

    # SiluAndMul in f32; the divide goes to the EUP via the approx reciprocal.
    h = gate * pl.reciprocal(1.0 + jnp.exp(-gate), approx=True) * up

    # down_proj partial product; bf16 MXU inputs, f32 accumulation.
    acc_ref[...] += jnp.dot(
        h.astype(wd_ref.dtype), wd_ref[...], preferred_element_type=jnp.float32
    )

    @pl.when(j == pl.num_programs(1) - 1)
    def _():
        o_ref[...] = acc_ref[...].astype(o_ref.dtype)


@functools.partial(jax.jit, static_argnames=("block_tokens",))
def glm4_moe_mlp(x, w_gu, w_down, *, block_tokens=256):
    """x: (T, H) -> (T, H).

    w_gu:   (I // block_i, H, 2 * block_i) packed gate/up weight (pack_gate_up)
    w_down: (I, H) down-projection weight (transposed vs torch nn.Linear).
    """
    T, H = x.shape
    if T == 0:  # matches the module's early-return for empty batches
        return x

    n_i, H_w, two_ti = w_gu.shape
    ti = two_ti // 2
    I = n_i * ti
    assert H_w == H and two_ti == 2 * ti
    assert w_down.shape == (I, H)

    out_dtype = x.dtype
    w_dtype = w_gu.dtype
    # Explicit fast MXU path: activations enter at the weight dtype.
    x = x.astype(w_dtype)

    xb = jnp.dtype(w_dtype).itemsize
    wb = jnp.dtype(w_dtype).itemsize
    wdb = jnp.dtype(w_down.dtype).itemsize
    ob = jnp.dtype(out_dtype).itemsize

    # Token tile: rounded to the dtype's sublane multiple, sized to minimize
    # padding, and split into >=2 tiles when possible (v7x megacore).
    sub = 8 * max(1, 4 // xb)               # 8 for f32, 16 for bf16, 32 for i8
    tm_cap = _round_up(block_tokens, sub)
    want_tiles = max(_cdiv(T, block_tokens), 2)
    tm = _round_up(_cdiv(T, want_tiles), sub)
    tm = min(tm, tm_cap, _round_up(T, sub))
    T_pad = _round_up(T, tm)
    if T_pad != T:
        x = jnp.pad(x, ((0, T_pad - T), (0, 0)))  # zero rows -> zero outputs
    n_tok = T_pad // tm

    grid = (n_tok, n_i)

    # VMEM budget: double-buffered I/O tiles + f32 accumulator + in-kernel
    # intermediates (gu f32, h f32, bf16 cast of h) + headroom.
    io_tiles = 2 * (tm * H * xb + H * 2 * ti * wb + ti * H * wdb + tm * H * ob)
    acc_bytes = tm * H * 4
    inter_bytes = tm * 2 * ti * 4 + tm * ti * 4 + tm * ti * wdb
    vmem_limit = io_tiles + acc_bytes + inter_bytes + (4 << 20)
    vmem_limit = int(min(max(vmem_limit, 16 << 20), 128 << 20))

    # Weights are re-read per token tile only when streamed (n_i > 1); with a
    # single resident I block they are DMA'd exactly once.
    weight_passes = 1 if n_i == 1 else n_tok
    cost = pl.CostEstimate(
        flops=2 * T_pad * H * (2 * I) + 2 * T_pad * I * H,
        transcendentals=T_pad * I,
        bytes_accessed=int(
            T_pad * H * xb + T_pad * H * ob
            + weight_passes * (H * 2 * I * wb + I * H * wdb)
        ),
    )

    out = pl.pallas_call(
        _glm4_moe_mlp_kernel,
        out_shape=jax.ShapeDtypeStruct((T_pad, H), out_dtype),
        grid_spec=pltpu.PrefetchScalarGridSpec(
            num_scalar_prefetch=0,
            grid=grid,
            in_specs=[
                pl.BlockSpec((tm, H), lambda i, j: (i, 0)),
                # Leading (majormost) I-tile index -> contiguous weight DMA.
                pl.BlockSpec((None, H, 2 * ti), lambda i, j: (j, 0, 0)),
                pl.BlockSpec((ti, H), lambda i, j: (j, 0)),
            ],
            out_specs=pl.BlockSpec((tm, H), lambda i, j: (i, 0)),
            scratch_shapes=[pltpu.VMEM((tm, H), jnp.float32)],
        ),
        compiler_params=pltpu.CompilerParams(
            dimension_semantics=("parallel", "arbitrary"),
            vmem_limit_bytes=vmem_limit,
        ),
        cost_estimate=cost,
    )(x, w_gu, w_down)

    return out[:T]


if __name__ == "__main__":
    # Small shapes consistent with the module's forward:
    # hidden_size=256, intermediate_size=512.
    H, I = 256, 512

    key = jax.random.PRNGKey(0)
    kx1, kx2, kg, ku, kd = jax.random.split(key, 5)

    w_gate = (jax.random.normal(kg, (H, I), jnp.float32) * 0.05).astype(jnp.bfloat16)
    w_up = (jax.random.normal(ku, (H, I), jnp.float32) * 0.05).astype(jnp.bfloat16)
    w_down = (jax.random.normal(kd, (I, H), jnp.float32) * 0.05).astype(jnp.bfloat16)

    def ref_fn(x):
        xf = x.astype(jnp.float32)
        gate = xf @ w_gate.astype(jnp.float32)
        up = xf @ w_up.astype(jnp.float32)
        return (gate * jax.nn.sigmoid(gate) * up) @ w_down.astype(jnp.float32)

    ok = True

    # Case 1: ragged decode-sized batch, forced streaming (2 I tiles ->
    # exercises the accumulator / pl.when init-finalize path and token padding).
    T1 = 13
    x1 = jax.random.normal(kx1, (T1, H), jnp.float32).astype(jnp.bfloat16)
    w_gu_stream = pack_gate_up(w_gate, w_up, 256)
    out1 = glm4_moe_mlp(x1, w_gu_stream, w_down, block_tokens=256)
    jax.block_until_ready(out1)
    ok &= out1.shape == (T1, H)
    ok &= bool(jnp.allclose(out1.astype(jnp.float32), ref_fn(x1),
                            atol=2e-2, rtol=2e-2))

    # Case 2: prefill-sized batch, block_i auto-chosen from VMEM capacity
    # (weights VMEM-resident when they fit), multiple token tiles + adaptive
    # token-tile padding.
    T2 = 300
    x2 = jax.random.normal(kx2, (T2, H), jnp.float32).astype(jnp.bfloat16)
    block_i = choose_block_i(H, I, block_tokens=256)
    w_gu_auto = pack_gate_up(w_gate, w_up, block_i)
    out2 = glm4_moe_mlp(x2, w_gu_auto, w_down, block_tokens=256)
    jax.block_until_ready(out2)
    ok &= out2.shape == (T2, H)
    ok &= bool(jnp.allclose(out2.astype(jnp.float32), ref_fn(x2),
                            atol=2e-2, rtol=2e-2))

    if not ok:
        raise SystemExit("mismatch vs reference")
    print("KERNEL_OK")
</pallas_src>

<mosaic_0001>
module attributes {stable_mosaic.version = 11 : i64} {
  func.func @_glm4_moe_mlp_kernel(%arg0: i32, %arg1: i32, %arg2: memref<16x256xbf16, #tpu.memory_space<vmem>>, %arg3: memref<1x256x512xbf16, #tpu.memory_space<vmem>>, %arg4: memref<256x256xbf16, #tpu.memory_space<vmem>>, %arg5: memref<16x256xbf16, #tpu.memory_space<vmem>>, %arg6: memref<16x256xf32, #tpu.memory_space<vmem>>) attributes {dimension_semantics = [#tpu.dimension_semantics<parallel>, #tpu.dimension_semantics<arbitrary>], iteration_bounds = array<i64: 1, 2>, scalar_prefetch = 0 : i64, scratch_operands = 1 : i64, tpu.core_type = #tpu.core_type<tc>, window_params = [{transform_indices = @transform_0, window_bounds = array<i64: 16, 256>}, {transform_indices = @transform_1, window_bounds = array<i64: 1, 256, 512>}, {transform_indices = @transform_2, window_bounds = array<i64: 256, 256>}, {transform_indices = @transform_3, window_bounds = array<i64: 16, 256>}]} {
    %c0_i32 = arith.constant 0 : i32
    %0 = arith.cmpi eq, %arg1, %c0_i32 : i32
    %1 = arith.extui %0 : i1 to i32
    %c0_i32_0 = arith.constant 0 : i32
    %2 = arith.cmpi ne, %1, %c0_i32_0 : i32
    scf.if %2 {
      %cst_15 = arith.constant 0.000000e+00 : f32
      %26 = vector.broadcast %cst_15 : f32 to vector<16x256xf32>
      %c0_16 = arith.constant 0 : index
      %c0_17 = arith.constant 0 : index
      %27 = vector.load %arg6[%c0_16, %c0_17] : memref<16x256xf32, #tpu.memory_space<vmem>>, vector<16x256xf32>
      tpu.vector_store %arg6[%c0_16, %c0_17], %26 {strides = array<i32>} : memref<16x256xf32, #tpu.memory_space<vmem>>, vector<16x256xf32>,
    } else {
    }
    %c0 = arith.constant 0 : index
    %c0_1 = arith.constant 0 : index
    %3 = vector.load %arg2[%c0, %c0_1] : memref<16x256xbf16, #tpu.memory_space<vmem>>, vector<16x256xbf16>
    %c0_2 = arith.constant 0 : index
    %c0_3 = arith.constant 0 : index
    %c0_4 = arith.constant 0 : index
    %4 = vector.load %arg3[%c0_2, %c0_3, %c0_4] : memref<1x256x512xbf16, #tpu.memory_space<vmem>>, vector<1x256x512xbf16>
    %5 = vector.shape_cast %4 : vector<1x256x512xbf16> to vector<256x512xbf16>
    %cst = arith.constant dense<0.000000e+00> : vector<16x512xf32>
    %6 = tpu.matmul %3, %5, %cst {dimension_numbers = #tpu.dot_dimension_numbers<[1], [0], [0], [1], [0, 0, 1, 1], [], []>} : vector<16x256xbf16>, vector<256x512xbf16>, vector<16x512xf32> -> vector<16x512xf32>
    %7 = vector.extract_strided_slice %6 {offsets = [0, 0], sizes = [16, 256], strides = [1, 1]} : vector<16x512xf32> to vector<16x256xf32>
    %8 = vector.extract_strided_slice %6 {offsets = [0, 256], sizes = [16, 256], strides = [1, 1]} : vector<16x512xf32> to vector<16x256xf32>
    %cst_5 = arith.constant 0.000000e+00 : f32
    %9 = vector.broadcast %cst_5 : f32 to vector<16x256xf32>
    %10 = arith.subf %9, %7 : vector<16x256xf32>
    %11 = math.exp %10 : vector<16x256xf32>
    %cst_6 = arith.constant 1.000000e+00 : f32
    %12 = vector.broadcast %cst_6 : f32 to vector<16x256xf32>
    %13 = arith.addf %12, %11 : vector<16x256xf32>
    %14 = tpu.reciprocal %13 {approx = true} : vector<16x256xf32> -> vector<16x256xf32>
    %15 = arith.mulf %7, %14 : vector<16x256xf32>
    %16 = arith.mulf %15, %8 : vector<16x256xf32>
    %c0_7 = arith.constant 0 : index
    %c0_8 = arith.constant 0 : index
    %17 = vector.load %arg6[%c0_7, %c0_8] : memref<16x256xf32, #tpu.memory_space<vmem>>, vector<16x256xf32>
    %18 = arith.truncf %16 : vector<16x256xf32> to vector<16x256xbf16>
    %c0_9 = arith.constant 0 : index
    %c0_10 = arith.constant 0 : index
    %19 = vector.load %arg4[%c0_9, %c0_10] : memref<256x256xbf16, #tpu.memory_space<vmem>>, vector<256x256xbf16>
    %cst_11 = arith.constant dense<0.000000e+00> : vector<16x256xf32>
    %20 = tpu.matmul %18, %19, %cst_11 {dimension_numbers = #tpu.dot_dimension_numbers<[1], [0], [0], [1], [0, 0, 1, 1], [], []>} : vector<16x256xbf16>, vector<256x256xbf16>, vector<16x256xf32> -> vector<16x256xf32>
    %21 = arith.addf %17, %20 : vector<16x256xf32>
    %c0_12 = arith.constant 0 : index
    %c0_13 = arith.constant 0 : index
    %22 = vector.load %arg6[%c0_12, %c0_13] : memref<16x256xf32, #tpu.memory_space<vmem>>, vector<16x256xf32>
    tpu.vector_store %arg6[%c0_12, %c0_13], %21 {strides = array<i32>} : memref<16x256xf32, #tpu.memory_space<vmem>>, vector<16x256xf32>,
    %c1_i32 = arith.constant 1 : i32
    %23 = arith.cmpi eq, %arg1, %c1_i32 : i32
    %24 = arith.extui %23 : i1 to i32
    %c0_i32_14 = arith.constant 0 : i32
    %25 = arith.cmpi ne, %24, %c0_i32_14 : i32
    scf.if %25 {
      %c0_15 = arith.constant 0 : index
      %c0_16 = arith.constant 0 : index
      %26 = vector.load %arg6[%c0_15, %c0_16] : memref<16x256xf32, #tpu.memory_space<vmem>>, vector<16x256xf32>
      %27 = arith.truncf %26 : vector<16x256xf32> to vector<16x256xbf16>
      %c0_17 = arith.constant 0 : index
      %c0_18 = arith.constant 0 : index
      %28 = vector.load %arg5[%c0_17, %c0_18] : memref<16x256xbf16, #tpu.memory_space<vmem>>, vector<16x256xbf16>
      tpu.vector_store %arg5[%c0_17, %c0_18], %27 {strides = array<i32>} : memref<16x256xbf16, #tpu.memory_space<vmem>>, vector<16x256xbf16>,
    } else {
    }
    return
  }
  func.func @transform_0(%arg0: i32, %arg1: i32) -> (i32, i32) {
    %c0_i32 = arith.constant 0 : i32
    %c0_i32_0 = arith.constant 0 : i32
    return %arg0, %c0_i32 : i32, i32
  }
  func.func @transform_1(%arg0: i32, %arg1: i32) -> (i32, i32, i32) {
    %c0_i32 = arith.constant 0 : i32
    %c0_i32_0 = arith.constant 0 : i32
    %c0_i32_1 = arith.constant 0 : i32
    return %arg1, %c0_i32, %c0_i32_0 : i32, i32, i32
  }
  func.func @transform_2(%arg0: i32, %arg1: i32) -> (i32, i32) {
    %c0_i32 = arith.constant 0 : i32
    %c0_i32_0 = arith.constant 0 : i32
    return %arg1, %c0_i32 : i32, i32
  }
  func.func @transform_3(%arg0: i32, %arg1: i32) -> (i32, i32) {
    %c0_i32 = arith.constant 0 : i32
    %c0_i32_0 = arith.constant 0 : i32
    return %arg0, %c0_i32 : i32, i32
  }
}

</mosaic_0001>

<bundles_post_ra>
// kernel: glm4_moe_mlp.1
= control target key start
LH: loop header
LB: loop body
LE: loop exit
PB: predicated region body
PF: predicated region fallthrough
CT: control target
= control target key end

     0   :  { %8 = vsyncpa [#allocation4], 0  ;;  %s1941_s0 = inlined_call_operand.vmem [shape: bf16[16,256], index: 0, kind: input, shape index: {}]   ;;  %s1942_s1 = inlined_call_operand.hbm [shape: bf16[2,256,512], index: 1, kind: input, shape index: {}]   ;;  %s1943_s2 = inlined_call_operand.hbm [shape: bf16[512,256], index: 2, kind: input, shape index: {}]   ;;  %s1944_s3 = inlined_call_operand.hbm [shape: bf16[16,256], index: 3, kind: output, shape index: {}]  }
   0x1   :  { %10 = vsyncpa [#allocation4 + $0x1], 0 }
   0x2   :  { %11 = vsyncpa [#allocation7], 0 }
   0x3   :  { %13 = vsyncpa [#allocation7 + $0x1], 0 }
   0x4   :  { %14 = vsyncpa [#allocation5], 0  ;;  %s1695_s12 = smov 0   ;;  %s1697_s13 = smov 0  }
   0x5   :  { %s1699_s14 = smov 0   ;;  %s1701_s15 = smov 0  }
   0x6   :  { %s1703_s16 = smov 0   ;;  %s1705_s17 = smov 0  }
   0x7 LB: > { %s1163_s18 = sadd.s32 4294967295, %s1663_s17   ;;  %s29_s19 = sadd.s32 1, %s1659_s16  ;;  %s1663_s17 = sphi %s1705_s17, %s20_s17   ;;  %s1659_s16 = sphi %s1703_s16, %s1954_s16   ;;  %s1655_s15 = sphi %s1701_s15, %s1953_s15   ;;  %s1651_s14 = sphi %s1699_s14, %s1952_s14   ;;  %s1647_s13 = sphi %s1697_s13, %s1951_s13   ;;  %s1643_s12 = sphi %s1695_s12, %s1950_s12  }
   0x8   : > { %p30_p0 = scmp.ge.s32.totalorder %s29_s19, 2  ;;  %s65_s20 = sadd.s32 1, %s1651_s14 }
   0x9   : > { %p72_p1 = scmp.ne.s32.totalorder %s1651_s14, %s1647_s13  ;;  %p73_p2 = scmp.eq.s32.totalorder %s1663_s17, 0 }
   0xa   : > { %s1956_s19 = smov (%p30_p0, %s29_s19), 0  ;;  %p78_p4 = scmp.ne.s32.totalorder %s1647_s13, %s1643_s12 }
   0xb   : > { %p1731_p3 = por %p73_p2, %p72_p1  ;;  %s62_s22 = ssub.s32 %s1659_s16, %s1956_s19 }
   0xc   : > { %p79_p5 = scmp.eq.s32.totalorder %s1163_s18, 0  ;;  %p63_p6 = scmp.eq.s32.totalorder %s62_s22, 0 }
   0xd   : > { %p1303_p8 = scmp.lt.s32.totalorder %s1663_s17, 2  ;;  %s1749_s25 = sand.u32 1, %s1651_s14  }
   0xe   : > { %p1740_p7 = por %p79_p5, %p78_p4  ;;  %s1283_s26 = sshll.u32 %s1659_s16, 13 }
   0xf   : > { %s1746_s24 = scalar_select %p63_p6, %s1651_s14, %s65_s20  }
  0x10   : > { %s1167_s27 = sshll.u32 %s1749_s25, 9  ;;  %s174_s30 = scalar_lea.hbm %s1942_s1, %s1283_s26 }
  0x11   : > { %s168_s4 = scalar_lea.vmem [#allocation3], %s1167_s27  ;;  %p1758_p9 = pnand %p1303_p8, %p1731_p3 }
  0x12   : > { %s175_s5 = sshll.u32 %s168_s4, 4  ;;  %s165_s7 = scalar_lea.sflag [#allocation4], %s1749_s25  ;;  %s176_s5 = int_to_ptr.vmem [resolvable:$true] %s175_s5 }
  0x13   : > { %p1527_p10 = pneg %p1758_p9  ;;  %s1538_s8 = scalar_lea.vmem %s176_s5, 8192 }
  0x14   : > { %p1539_p11 = scmp.ne.s32.totalorder %s176_s5, %s1538_s8  ;;  %s1665_s9 = smov [#allocation3]  }
  0x15   : > { %s1543_s10 = sshll.u32 %s1665_s9, 4  ;;  %s1544_s10 = int_to_ptr.vmem [resolvable:$false] %s1543_s10 }
  0x16   : > { %p1541_p12 = pnand %p1539_p11, %p1527_p10  ;;  %s1545_s11 = scalar_lea.vmem %s1544_s10, 16384 }
  0x17   : > { %p1546_p0 = scmp.lt.s32.totalorder %s176_s5, %s1544_s10  ;;  %p1547_p1 = scmp.lt.s32.totalorder %s1545_s11, %s1538_s8 }
  0x18   : > { %p1542_p13 = pneg %p1541_p12 }
  0x19   : > { %p1548_p2 = por %p1547_p1, %p1546_p0 }
  0x1b   : > { %p1549_p3 = pnand %p1548_p2, %p1542_p13 }
  0x1d   : > { %1552 = shalt.err (!%p1549_p3)
}
  0x1e   : > { %s1666_s12 = smov 256   ;;  %s1667_s20 = smov 16  }
  0x1f   : > { %1299 = dma.hbm_to_vmem [thread:$0]  (!%p1758_p9), %s174_s30, 8192, %s176_s5, %s165_s7, %s1666_s12, %s1666_s12, %s1667_s20  }
  0x20   : > { %p1174_p4 = scmp.ge.s32.totalorder %s1663_s17, 1  ;;  %p205_p5 = scmp.lt.s32.totalorder %s1663_s17, 3 }
  0x21   : > { %s1170_s21 = sshll.u32 %s1749_s25, 8  ;;  %s1285_s26 = sshll.u32 %s1659_s16, 12 }
  0x22   : > { %p1773_p6 = pnand %p1174_p4, %p205_p5  ;;  %s189_s27 = scalar_lea.vmem [#allocation6], %s1170_s21 }
  0x23   : > { %s197_s28 = sshll.u32 %s189_s27, 4  ;;  %s196_s8 = scalar_lea.hbm %s1943_s2, %s1285_s26  ;;  %s198_s28 = int_to_ptr.vmem [resolvable:$true] %s197_s28 }
  0x24   : > { %s186_s9 = scalar_lea.sflag [#allocation7], %s1749_s25  ;;  %s1566_s10 = scalar_lea.vmem %s198_s28, 4096 }
  0x25   : > { %p1567_p8 = scmp.ne.s32.totalorder %s198_s28, %s1566_s10  ;;  %s1668_s30 = smov [#allocation6]  }
  0x26   : > { %s1571_s5 = sshll.u32 %s1668_s30, 4  ;;  %s1572_s5 = int_to_ptr.vmem [resolvable:$false] %s1571_s5 }
  0x27   : > { %p1569_p11 = pnand %p1567_p8, %p1527_p10  ;;  %s1573_s7 = scalar_lea.vmem %s1572_s5, 8192 }
  0x28   : > { %p1574_p13 = scmp.lt.s32.totalorder %s198_s28, %s1572_s5  ;;  %p1575_p0 = scmp.lt.s32.totalorder %s1573_s7, %s1566_s10 }
  0x29   : > { %p1570_p12 = pneg %p1569_p11 }
  0x2a   : > { %p1576_p1 = por %p1575_p0, %p1574_p13 }
  0x2c   : > { %p1577_p2 = pnand %p1576_p1, %p1570_p12 }
  0x2e   : > { %1580 = shalt.err (!%p1577_p2)
}
  0x2f   : > { %s1669_s11 = smov 128   ;;  %s1670_s12 = smov 8  }
  0x30   : > { %1302 = dma.hbm_to_vmem [thread:$0]  (!%p1758_p9), %s196_s8, 4096, %s198_s28, %s186_s9, %s1669_s11, %s1669_s11, %s1670_s12  }
  0x31   : > { %209 = sbr.rel (%p1773_p6) target bundleno = 601 (0x259), region = 32  ;;  %s211_s25 = sand.u32 (!%p1773_p6), 1, %s1647_s13  }
  0x32   : > { %s1175_s20 = sshll.u32 (!%p1773_p6), %s211_s25, 9  ;;  %s212_s21 = scalar_lea.sflag (!%p1773_p6), [#allocation4], %s211_s25 }
  0x33   : > { %s1790_s26 = scalar_lea.vmem (!%p1773_p6), [#allocation3], %s1175_s20 }
  0x36   : > { %1630 = dma.done.wait (%p1740_p7), %s212_s21, 8192  }
  0x37   : > { %1632 = vsyncadd (%p1740_p7), %s212_s21, 4294959104  ;;  %s1176_s27 = sshll.u32 %s211_s25, 8  ;;  %s221_s29 = scalar_lea.sflag [#allocation7], %s211_s25 }
  0x38   : > { %s1796_s6 = scalar_lea.vmem [#allocation6], %s1176_s27 }
  0x39   : > { %1634 = dma.done.wait (%p1740_p7), %s221_s29, 4096  }
  0x3a   : > { %1636 = vsyncadd (%p1740_p7), %s221_s29, 4294963200  ;;  %p1177_p9 = scmp.ne.s32.totalorder %s1655_s15, 0 }
  0x3c   : > { %265 = sbr.rel (%p1177_p9) target bundleno = 68 (0x44), region = 44 }
  0x41   : > { %v1671_v0 = vmov 0.0  }
  0x42   : > { %266 = vst [vmem:[#allocation2 + $0x10] sm:$0xff] %v1671_v0  ;;  %267 = vst [vmem:[#allocation2] sm:$0xff] %v1671_v0 }
  0x43   : > { %268 = vst [vmem:[#allocation2 + $0x18] sm:$0xff] %v1671_v0  ;;  %269 = vst [vmem:[#allocation2 + $0x8] sm:$0xff] %v1671_v0 }
  0x44 PF: > { %v1362_v1 = vld [vmem:[%s1790_s26 + $0xe4] ss:$16 sps:$4 sm:$0xff]   ;;  %v1364_v2 = vld [vmem:[%s1790_s26 + $0xe0] ss:$16 sps:$4 sm:$0xff]   ;;  %v1386_v9 = vld [vmem:[%s1790_s26 + $0xec] ss:$16 sps:$4 sm:$0xff]  }
  0x45   : > { %666 = vmatprep.subr.bf16.mxu0 %v1362_v1  ;;  %v1365_v3 = vld [vmem:[%s1790_s26 + $0xc4] ss:$16 sps:$4 sm:$0xff]   ;;  %v1367_v4 = vld [vmem:[%s1790_s26 + $0xc0] ss:$16 sps:$4 sm:$0xff]   ;;  %v1388_v10 = vld [vmem:[%s1790_s26 + $0xe8] ss:$16 sps:$4 sm:$0xff]   ;;  %709 = vmatprep.subr.bf16.mxu1 %v1386_v9 }
  0x46   : > { %667 = vmatpush1.bf16.msra.mxu0 %v1364_v2  ;;  %v1368_v5 = vld [vmem:[%s1790_s26 + $0xa4] ss:$16 sps:$4 sm:$0xff]   ;;  %v1370_v6 = vld [vmem:[%s1790_s26 + $0xa0] ss:$16 sps:$4 sm:$0xff]   ;;  %710 = vmatpush1.bf16.msra.mxu1 %v1388_v10  ;;  %v1392_v12 = vld [vmem:[%s1790_s26 + $0xcc] ss:$16 sps:$4 sm:$0xff]  }
  0x47   : > { %668 = vmatprep.subr.bf16.mxu0 %v1365_v3  ;;  %v1371_v7 = vld [vmem:[%s1790_s26 + $0x84] ss:$16 sps:$4 sm:$0xff]   ;;  %v1373_v8 = vld [vmem:[%s1790_s26 + $0x80] ss:$16 sps:$4 sm:$0xff]   ;;  %v1394_v13 = vld [vmem:[%s1790_s26 + $0xc8] ss:$16 sps:$4 sm:$0xff]   ;;  %711 = vmatprep.subr.bf16.mxu1 %v1392_v12 }
  0x48   : > { %v1374_v11 = vld [vmem:[%s1790_s26 + $0x64] ss:$16 sps:$4 sm:$0xff]   ;;  %v1376_v14 = vld [vmem:[%s1790_s26 + $0x60] ss:$16 sps:$4 sm:$0xff]   ;;  %v1398_v16 = vld [vmem:[%s1790_s26 + $0xac] ss:$16 sps:$4 sm:$0xff]  }
  0x49   : > { %v1377_v15 = vld [vmem:[%s1790_s26 + $0x44] ss:$16 sps:$4 sm:$0xff]   ;;  %v1400_v17 = vld [vmem:[%s1790_s26 + $0xa8] ss:$16 sps:$4 sm:$0xff]   ;;  %v1379_v18 = vld [vmem:[%s1790_s26 + $0x40] ss:$16 sps:$4 sm:$0xff]  }
  0x4a   : > { %669 = vmatpush1.bf16.msra.mxu0 %v1367_v4  ;;  %712 = vmatpush1.bf16.msra.mxu1 %v1394_v13  ;;  %v1404_v19 = vld [vmem:[%s1790_s26 + $0x8c] ss:$16 sps:$4 sm:$0xff]   ;;  %v1380_v20 = vld [vmem:[%s1790_s26 + $0x24] ss:$16 sps:$4 sm:$0xff]   ;;  %v1406_v21 = vld [vmem:[%s1790_s26 + $0x88] ss:$16 sps:$4 sm:$0xff]  }
  0x4b   : > { %670 = vmatprep.subr.bf16.mxu0 %v1368_v5  ;;  %713 = vmatprep.subr.bf16.mxu1 %v1398_v16  ;;  %v1382_v22 = vld [vmem:[%s1790_s26 + $0x20] ss:$16 sps:$4 sm:$0xff]   ;;  %v1410_v23 = vld [vmem:[%s1790_s26 + $0x6c] ss:$16 sps:$4 sm:$0xff]   ;;  %v1383_v24 = vld [vmem:[%s1790_s26 + $0x4] ss:$16 sps:$4 sm:$0xff]  }
  0x4c   : > { %v1412_v25 = vld [vmem:[%s1790_s26 + $0x68] ss:$16 sps:$4 sm:$0xff]   ;;  %v1385_v26 = vld [vmem:[%s1790_s26] ss:$16 sps:$4 sm:$0xff]   ;;  %v1416_v27 = vld [vmem:[%s1790_s26 + $0x4c] ss:$16 sps:$4 sm:$0xff]  }
  0x4d   : > { %v1389_v28 = vld [vmem:[%s1790_s26 + $0x1e4] ss:$16 sps:$4 sm:$0xff]   ;;  %v1418_v29 = vld [vmem:[%s1790_s26 + $0x48] ss:$16 sps:$4 sm:$0xff]   ;;  %v1391_v30 = vld [vmem:[%s1790_s26 + $0x1e0] ss:$16 sps:$4 sm:$0xff]  }
  0x4e   : > { %671 = vmatpush1.bf16.msra.mxu0 %v1370_v6  ;;  %714 = vmatpush1.bf16.msra.mxu1 %v1400_v17  ;;  %v1422_v31 = vld [vmem:[%s1790_s26 + $0x2c] ss:$16 sps:$4 sm:$0xff]   ;;  %v1395_v32 = vld [vmem:[%s1790_s26 + $0x1c4] ss:$16 sps:$4 sm:$0xff]   ;;  %v1424_v33 = vld [vmem:[%s1790_s26 + $0x28] ss:$16 sps:$4 sm:$0xff]  }
  0x4f   : > { %672 = vmatprep.subr.bf16.mxu0 %v1371_v7  ;;  %715 = vmatprep.subr.bf16.mxu1 %v1404_v19  ;;  %v1438_v34 = vld [vmem:[%s1941_s0 + $0x4] ss:$8 sps:$4 sm:$0xff]   ;;  %v1397_v35 = vld [vmem:[%s1790_s26 + $0x1c0] ss:$16 sps:$4 sm:$0xff]   ;;  %v1430_v38 = vld [vmem:[%s1790_s26 + $0x8] ss:$16 sps:$4 sm:$0xff]  }
  0x50   : > { %v1428_v36 = vld [vmem:[%s1790_s26 + $0xc] ss:$16 sps:$4 sm:$0xff]   ;;  %v1401_v37 = vld [vmem:[%s1790_s26 + $0x1a4] ss:$16 sps:$4 sm:$0xff]   ;;  %698 = vmatprep.mubr.bf16.mxu0 %v1438_v34  ;;  %741 = vmatprep.mubr.bf16.mxu1 %v1438_v34  ;;  %v1403_v39 = vld [vmem:[%s1790_s26 + $0x1a0] ss:$16 sps:$4 sm:$0xff]  }
  0x51   : > { %v1434_v40 = vld [vmem:[%s1790_s26 + $0x1ec] ss:$16 sps:$4 sm:$0xff]   ;;  %v1407_v41 = vld [vmem:[%s1790_s26 + $0x184] ss:$16 sps:$4 sm:$0xff]   ;;  %v1439_v42 = vld [vmem:[%s1790_s26 + $0x1e8] ss:$16 sps:$4 sm:$0xff]  }
  0x52   : > { %673 = vmatpush1.bf16.msra.mxu0 %v1373_v8  ;;  %716 = vmatpush1.bf16.msra.mxu1 %v1406_v21  ;;  %v1409_v43 = vld [vmem:[%s1790_s26 + $0x180] ss:$16 sps:$4 sm:$0xff]   ;;  %v1440_v44 = vld [vmem:[%s1790_s26 + $0x1cc] ss:$16 sps:$4 sm:$0xff]   ;;  %v1413_v45 = vld [vmem:[%s1790_s26 + $0x164] ss:$16 sps:$4 sm:$0xff]  }
  0x53   : > { %674 = vmatprep.subr.bf16.mxu0 %v1374_v11  ;;  %717 = vmatprep.subr.bf16.mxu1 %v1410_v23  ;;  %v1415_v46 = vld [vmem:[%s1790_s26 + $0x160] ss:$16 sps:$4 sm:$0xff]   ;;  %v1442_v47 = vld [vmem:[%s1790_s26 + $0x1c8] ss:$16 sps:$4 sm:$0xff]   ;;  %v1419_v48 = vld [vmem:[%s1790_s26 + $0x144] ss:$16 sps:$4 sm:$0xff]  }
  0x54   : > { %v1443_v49 = vld [vmem:[%s1790_s26 + $0x1ac] ss:$16 sps:$4 sm:$0xff]   ;;  %v1445_v50 = vld [vmem:[%s1790_s26 + $0x1a8] ss:$16 sps:$4 sm:$0xff]   ;;  %v1421_v51 = vld [vmem:[%s1790_s26 + $0x140] ss:$16 sps:$4 sm:$0xff]  }
  0x55   : > { %v1446_v52 = vld [vmem:[%s1790_s26 + $0x18c] ss:$16 sps:$4 sm:$0xff]   ;;  %v1425_v53 = vld [vmem:[%s1790_s26 + $0x124] ss:$16 sps:$4 sm:$0xff]   ;;  %v1448_v54 = vld [vmem:[%s1790_s26 + $0x188] ss:$16 sps:$4 sm:$0xff]  }
  0x56   : > { %675 = vmatpush1.bf16.msra.mxu0 %v1376_v14  ;;  %718 = vmatpush1.bf16.msra.mxu1 %v1412_v25  ;;  %v1427_v55 = vld [vmem:[%s1790_s26 + $0x120] ss:$16 sps:$4 sm:$0xff]   ;;  %v1449_v56 = vld [vmem:[%s1790_s26 + $0x16c] ss:$16 sps:$4 sm:$0xff]   ;;  %v1431_v57 = vld [vmem:[%s1790_s26 + $0x104] ss:$16 sps:$4 sm:$0xff]  }
  0x57   : > { %676 = vmatprep.subr.bf16.mxu0 %v1377_v15  ;;  %719 = vmatprep.subr.bf16.mxu1 %v1416_v27  ;;  %v1451_v58 = vld [vmem:[%s1790_s26 + $0x168] ss:$16 sps:$4 sm:$0xff]   ;;  %v1433_v59 = vld [vmem:[%s1790_s26 + $0x100] ss:$16 sps:$4 sm:$0xff]   ;;  %v1452_v60 = vld [vmem:[%s1790_s26 + $0x14c] ss:$16 sps:$4 sm:$0xff]  }
  0x58   : > { %v1463_v61 = vld [vmem:[%s1796_s6 + $0x74] ss:$8 sps:$4 sm:$0xff]   ;;  %v1436_v62 = vld [vmem:[%s1941_s0] ss:$8 sps:$4 sm:$0xff]   ;;  %v1461_v1 = vld [vmem:[%s1796_s6 + $0x70] ss:$8 sps:$4 sm:$0xff]  }
  0x59   : > { %v1454_v63 = vld [vmem:[%s1790_s26 + $0x148] ss:$16 sps:$4 sm:$0xff]   ;;  %v1455_v0 = vld [vmem:[%s1790_s26 + $0x12c] ss:$16 sps:$4 sm:$0xff]   ;;  %p1276_p7 = scmp.ne.s32.totalorder %s1655_s15, 1 }
  0x5a   : > { %677 = vmatpush1.bf16.msra.mxu0 %v1379_v18  ;;  %720 = vmatpush1.bf16.msra.mxu1 %v1418_v29  ;;  %v1466_v2 = vld [vmem:[%s1796_s6 + $0x64] ss:$8 sps:$4 sm:$0xff]   ;;  %v1457_v3 = vld [vmem:[%s1790_s26 + $0x128] ss:$16 sps:$4 sm:$0xff]   ;;  %v1469_v6 = vld [vmem:[%s1796_s6 + $0x54] ss:$8 sps:$4 sm:$0xff]  }
  0x5b   : > { %678 = vmatprep.subr.bf16.mxu0 %v1380_v20  ;;  %721 = vmatprep.subr.bf16.mxu1 %v1422_v31  ;;  %v1458_v4 = vld [vmem:[%s1790_s26 + $0x10c] ss:$16 sps:$4 sm:$0xff]   ;;  %v1464_v5 = vld [vmem:[%s1796_s6 + $0x60] ss:$8 sps:$4 sm:$0xff]   ;;  %v1467_v8 = vld [vmem:[%s1796_s6 + $0x50] ss:$8 sps:$4 sm:$0xff]  }
  0x5c   : > { %v1460_v7 = vld [vmem:[%s1790_s26 + $0x108] ss:$16 sps:$4 sm:$0xff]   ;;  %v1472_v9 = vld [vmem:[%s1796_s6 + $0x44] ss:$8 sps:$4 sm:$0xff]   ;;  %v1475_v11 = vld [vmem:[%s1796_s6 + $0x34] ss:$8 sps:$4 sm:$0xff]  }
  0x5d   : > { %v1470_v10 = vld [vmem:[%s1796_s6 + $0x40] ss:$8 sps:$4 sm:$0xff]   ;;  %v1473_v12 = vld [vmem:[%s1796_s6 + $0x30] ss:$8 sps:$4 sm:$0xff]   ;;  %v1478_v13 = vld [vmem:[%s1796_s6 + $0x24] ss:$8 sps:$4 sm:$0xff]  }
  0x5e   : > { %679 = vmatpush1.bf16.msra.mxu0 %v1382_v22  ;;  %722 = vmatpush1.bf16.msra.mxu1 %v1424_v33  ;;  %v1476_v14 = vld [vmem:[%s1796_s6 + $0x20] ss:$8 sps:$4 sm:$0xff]   ;;  %v1481_v15 = vld [vmem:[%s1796_s6 + $0x14] ss:$8 sps:$4 sm:$0xff]   ;;  %v1479_v16 = vld [vmem:[%s1796_s6 + $0x10] ss:$8 sps:$4 sm:$0xff]  }
  0x5f   : > { %680 = vmatprep.subr.bf16.mxu0 %v1383_v24  ;;  %723 = vmatprep.subr.bf16.mxu1 %v1428_v36  ;;  %v1484_v17 = vld [vmem:[%s1796_s6 + $0x4] ss:$8 sps:$4 sm:$0xff]   ;;  %v1482_v18 = vld [vmem:[%s1796_s6] ss:$8 sps:$4 sm:$0xff]   ;;  %v1487_v19 = vld [vmem:[%s1796_s6 + $0xf4] ss:$8 sps:$4 sm:$0xff]  }
  0x60   : > { %v1485_v20 = vld [vmem:[%s1796_s6 + $0xf0] ss:$8 sps:$4 sm:$0xff]   ;;  %v1490_v21 = vld [vmem:[%s1796_s6 + $0xe4] ss:$8 sps:$4 sm:$0xff]   ;;  %v1488_v22 = vld [vmem:[%s1796_s6 + $0xe0] ss:$8 sps:$4 sm:$0xff]  }
  0x61   : > { %v1493_v23 = vld [vmem:[%s1796_s6 + $0xd4] ss:$8 sps:$4 sm:$0xff]   ;;  %v1491_v24 = vld [vmem:[%s1796_s6 + $0xd0] ss:$8 sps:$4 sm:$0xff]   ;;  %v1496_v25 = vld [vmem:[%s1796_s6 + $0xc4] ss:$8 sps:$4 sm:$0xff]  }
  0x62   : > { %681 = vmatpush1.bf16.msra.mxu0 %v1385_v26  ;;  %724 = vmatpush1.bf16.msra.mxu1 %v1430_v38  ;;  %v1494_v26 = vld [vmem:[%s1796_s6 + $0xc0] ss:$8 sps:$4 sm:$0xff]   ;;  %v1499_v27 = vld [vmem:[%s1796_s6 + $0xb4] ss:$8 sps:$4 sm:$0xff]   ;;  %v1502_v29 = vld [vmem:[%s1796_s6 + $0xa4] ss:$8 sps:$4 sm:$0xff]  }
  0x63   : > { %682 = vmatprep.subr.bf16.mxu0 %v1389_v28  ;;  %725 = vmatprep.subr.bf16.mxu1 %v1434_v40  ;;  %v1497_v28 = vld [vmem:[%s1796_s6 + $0xb0] ss:$8 sps:$4 sm:$0xff]   ;;  %v1505_v31 = vld [vmem:[%s1796_s6 + $0x94] ss:$8 sps:$4 sm:$0xff]   ;;  %v1508_v33 = vld [vmem:[%s1796_s6 + $0x84] ss:$8 sps:$4 sm:$0xff]  }
  0x64   : > { %v1506_v34 = vld [vmem:[%s1796_s6 + $0x80] ss:$8 sps:$4 sm:$0xff]  }
  0x66   : > { %683 = vmatpush2.bf16.msra.mxu0 %v1391_v30  ;;  %726 = vmatpush2.bf16.msra.mxu1 %v1439_v42  ;;  %v1500_v30 = vld [vmem:[%s1796_s6 + $0xa0] ss:$8 sps:$4 sm:$0xff]  }
  0x67   : > { %684 = vmatprep.subr.bf16.mxu0 %v1395_v32  ;;  %727 = vmatprep.subr.bf16.mxu1 %v1440_v44  ;;  %v1503_v32 = vld [vmem:[%s1796_s6 + $0x90] ss:$8 sps:$4 sm:$0xff]  }
  0x6a   : > { %685 = vmatpush2.bf16.msra.mxu0 %v1397_v35  ;;  %728 = vmatpush2.bf16.msra.mxu1 %v1442_v47 }
  0x6b   : > { %686 = vmatprep.subr.bf16.mxu0 %v1401_v37  ;;  %729 = vmatprep.subr.bf16.mxu1 %v1443_v49 }
  0x6e   : > { %687 = vmatpush2.bf16.msra.mxu0 %v1403_v39  ;;  %730 = vmatpush2.bf16.msra.mxu1 %v1445_v50 }
  0x6f   : > { %688 = vmatprep.subr.bf16.mxu0 %v1407_v41  ;;  %731 = vmatprep.subr.bf16.mxu1 %v1446_v52 }
  0x72   : > { %689 = vmatpush2.bf16.msra.mxu0 %v1409_v43  ;;  %732 = vmatpush2.bf16.msra.mxu1 %v1448_v54 }
  0x73   : > { %690 = vmatprep.subr.bf16.mxu0 %v1413_v45  ;;  %733 = vmatprep.subr.bf16.mxu1 %v1449_v56 }
  0x76   : > { %691 = vmatpush2.bf16.msra.mxu0 %v1415_v46  ;;  %734 = vmatpush2.bf16.msra.mxu1 %v1451_v58 }
  0x77   : > { %692 = vmatprep.subr.bf16.mxu0 %v1419_v48  ;;  %735 = vmatprep.subr.bf16.mxu1 %v1452_v60 }
  0x7a   : > { %693 = vmatpush2.bf16.msra.mxu0 %v1421_v51  ;;  %736 = vmatpush2.bf16.msra.mxu1 %v1454_v63 }
  0x7b   : > { %694 = vmatprep.subr.bf16.mxu0 %v1425_v53  ;;  %737 = vmatprep.subr.bf16.mxu1 %v1455_v0 }
  0x7e   : > { %695 = vmatpush2.bf16.msra.mxu0 %v1427_v55  ;;  %738 = vmatpush2.bf16.msra.mxu1 %v1457_v3 }
  0x7f   : > { %696 = vmatprep.subr.bf16.mxu0 %v1431_v57  ;;  %739 = vmatprep.subr.bf16.mxu1 %v1458_v4 }
  0x82   : > { %697 = vmatpush2.bf16.msra.mxu0 %v1433_v59  ;;  %740 = vmatpush2.bf16.msra.mxu1 %v1460_v7 }
  0x83   : > { %978 = vmatprep.subr.bf16.mxu0 %v1463_v61 }
  0x85   : > { %699 = vmatmul.mubr.bf16.vlgmr.msra.gmra.mxu0 %v1436_v62  ;;  %742 = vmatmul.mubr.bf16.vlgmr.msra.gmra.mxu1 %v1436_v62 }
  0x86   : > { %979 = vmatpush1.bf16.msra.mxu0 %v1461_v1 }
  0x87   : > { %980 = vmatprep.subr.bf16.mxu0 %v1466_v2 }
  0x8a   : > { %981 = vmatpush1.bf16.msra.mxu0 %v1464_v5 }
  0x8b   : > { %982 = vmatprep.subr.bf16.mxu0 %v1469_v6 }
  0x8e   : > { %983 = vmatpush1.bf16.msra.mxu0 %v1467_v8 }
  0x8f   : > { %984 = vmatprep.subr.bf16.mxu0 %v1472_v9  ;;  %v780_v9 = vld [vmem:[#allocation2 + $0x10] sm:$0xff] }
  0x92   : > { %985 = vmatpush1.bf16.msra.mxu0 %v1470_v10 }
  0x93   : > { %986 = vmatprep.subr.bf16.mxu0 %v1475_v11  ;;  %v781_v11 = vld [vmem:[#allocation2] sm:$0xff] }
  0x96   : > { %987 = vmatpush1.bf16.msra.mxu0 %v1473_v12 }
  0x97   : > { %988 = vmatprep.subr.bf16.mxu0 %v1478_v13 }
  0x9a   : > { %989 = vmatpush1.bf16.msra.mxu0 %v1476_v14  ;;  %v782_v14 = vld [vmem:[#allocation2 + $0x18] sm:$0xff] }
  0x9b   : > { %990 = vmatprep.subr.bf16.mxu0 %v1481_v15 }
  0x9e   : > { %991 = vmatpush1.bf16.msra.mxu0 %v1479_v16 }
  0x9f   : > { %992 = vmatprep.subr.bf16.mxu0 %v1484_v17  ;;  %v783_v17 = vld [vmem:[#allocation2 + $0x8] sm:$0xff] }
  0xa2   : > { %993 = vmatpush1.bf16.msra.mxu0 %v1482_v18 }
  0xa3   : > { %994 = vmatprep.subr.bf16.mxu0 %v1487_v19 }
  0xa6   : > { %995 = vmatpush2.bf16.msra.mxu0 %v1485_v20 }
  0xa7   : > { %996 = vmatprep.subr.bf16.mxu0 %v1490_v21 }
  0xaa   : > { %997 = vmatpush2.bf16.msra.mxu0 %v1488_v22 }
  0xab   : > { %998 = vmatprep.subr.bf16.mxu0 %v1493_v23 }
  0xae   : > { %999 = vmatpush2.bf16.msra.mxu0 %v1491_v24 }
  0xaf   : > { %1000 = vmatprep.subr.bf16.mxu0 %v1496_v25 }
  0xb2   : > { %1001 = vmatpush2.bf16.msra.mxu0 %v1494_v26 }
  0xb3   : > { %1002 = vmatprep.subr.bf16.mxu0 %v1499_v27 }
  0xb6   : > { %1003 = vmatpush2.bf16.msra.mxu0 %v1497_v28 }
  0xb7   : > { %1004 = vmatprep.subr.bf16.mxu0 %v1502_v29 }
  0xba   : > { %1005 = vmatpush2.bf16.msra.mxu0 %v1500_v30 }
  0xbb   : > { %1006 = vmatprep.subr.bf16.mxu0 %v1505_v31 }
  0xbe   : > { %1007 = vmatpush2.bf16.msra.mxu0 %v1503_v32 }
  0xbf   : > { %1008 = vmatprep.subr.bf16.mxu0 %v1508_v33 }
  0xc2   : > { %1009 = vmatpush2.bf16.msra.mxu0 %v1506_v34 }
 0x145   : > { %v700_v35 = vpop.f32.mrf.mxu0  ;;  %v743_v55 = vpop.f32.mrf.mxu1 }
 0x146   : > { %v752_v36 = vsub.f32 0.0, %v700_v35 }
 0x147   : > { %v702_v37 = vpop.f32.mrf.mxu0  ;;  %v745_v56 = vpop.f32.mrf.mxu1 }
 0x148   : > { %v756_v38 = vmul.f32 1.442695, %v752_v36  ;;  %v753_v39 = vsub.f32 0.0, %v702_v37 }
 0x149   : > { %v704_v40 = vpop.f32.mrf.mxu0  ;;  %v747_v60 = vpop.f32.mrf.mxu1 }
 0x14a   : > { %1509 = vpow2.f32 %v756_v38  ;;  %v758_v41 = vmul.f32 1.442695, %v753_v39  ;;  %v754_v42 = vsub.f32 0.0, %v704_v40 }
 0x14b   : > { %v706_v43 = vpop.f32.mrf.mxu0  ;;  %v749_v3 = vpop.f32.mrf.mxu1 }
 0x14c   : > { %1511 = vpow2.f32 %v758_v41  ;;  %v760_v44 = vmul.f32 1.442695, %v754_v42  ;;  %v755_v45 = vsub.f32 0.0, %v706_v43 }
 0x14e   : > { %1513 = vpow2.f32 %v760_v44  ;;  %v762_v46 = vmul.f32 1.442695, %v755_v45 }
 0x150   : > { %1515 = vpow2.f32 %v762_v46 }
 0x157   : > { %v1510_v47 = vpop.eup %1509 }
 0x158   : > { %v764_v49 = vadd.f32 1.0, %v1510_v47 }
 0x159   : > { %v1512_v48 = vpop.eup %1511 }
 0x15a   : > { %v765_v50 = vadd.f32 1.0, %v1512_v48 }
 0x15b   : > { %v1514_v51 = vpop.eup %1513 }
 0x15c   : > { %1517 = vrcp.f32 %v765_v50  ;;  %v766_v52 = vadd.f32 1.0, %v1514_v51 }
 0x15d   : > { %v1516_v53 = vpop.eup %1515  ;;  %1519 = vrcp.f32 %v764_v49 }
 0x15e   : > { %1521 = vrcp.f32 %v766_v52  ;;  %v767_v54 = vadd.f32 1.0, %v1516_v53 }
 0x160   : > { %1523 = vrcp.f32 %v767_v54 }
 0x169   : > { %v1518_v57 = vpop.eup %1517 }
 0x16a   : > { %v1520_v58 = vpop.eup %1519  ;;  %v773_v61 = vmul.f32 %v1518_v57, %v702_v37 }
 0x16b   : > { %v1522_v59 = vpop.eup %1521  ;;  %v772_v0 = vmul.f32 %v1520_v58, %v700_v35 }
 0x16c   : > { %v774_v62 = vmul.f32 %v1522_v59, %v704_v40  ;;  %v777_v4 = vmul.f32 %v773_v61, %v745_v56 }
 0x16d   : > { %v1524_v63 = vpop.eup %1523  ;;  %v776_v6 = vmul.f32 %v772_v0, %v743_v55 }
 0x16e   : > { %v775_v1 = vmul.f32 %v1524_v63, %v706_v43  ;;  %v778_v2 = vmul.f32 %v774_v62, %v747_v60 }
 0x170   : > { %v779_v5 = vmul.f32 %v775_v1, %v749_v3  ;;  %v784_v8 = vpack.c.bf16 %v778_v2, %v776_v6 }
 0x172   : > { %v785_v7 = vpack.c.bf16 %v779_v5, %v777_v4 }
 0x174   : > { %1010 = vmatprep.mubr.bf16.mxu0 %v785_v7 }
 0x175   : > { %1011 = vmatmul.mubr.bf16.vlgmr.msra.gmra.mxu0 %v784_v8 }
 0x235   : > { %v1012_v10 = vpop.f32.mrf.mxu0 }
 0x236   : > { %v1021_v12 = vadd.f32 %v1012_v10, %v780_v9 }
 0x237   : > { %v1014_v13 = vpop.f32.mrf.mxu0 }
 0x238   : > { %1025 = vst [vmem:[#allocation2 + $0x10] sm:$0xff] %v1021_v12  ;;  %v1022_v15 = vadd.f32 %v1014_v13, %v781_v11 }
 0x239   : > { %v1016_v16 = vpop.f32.mrf.mxu0 }
 0x23a   : > { %1026 = vst [vmem:[#allocation2] sm:$0xff] %v1022_v15  ;;  %v1023_v18 = vadd.f32 %v1016_v16, %v782_v14  ;;  %1032 = sbr.rel (%p1276_p7) target bundleno = 585 (0x249), region = 48 }
 0x23b   : > { %v1018_v19 = vpop.f32.mrf.mxu0 }
 0x23c   : > { %1027 = vst [vmem:[#allocation2 + $0x18] sm:$0xff] %v1023_v18  ;;  %v1024_v20 = vadd.f32 %v1018_v19, %v783_v17 }
 0x23e   : > { %1028 = vst [vmem:[#allocation2 + $0x8] sm:$0xff] %v1024_v20 }
 0x23f   : > { %v1033_v21 = vld [vmem:[#allocation2 + $0x10] sm:$0xff] }
 0x241   : > { %v1034_v22 = vld [vmem:[#allocation2] sm:$0xff] }
 0x242   : > { %v1286_v24 = vpack.c.bf16 %v1034_v22, %v1033_v21 }
 0x243   : > { %v1035_v23 = vld [vmem:[#allocation2 + $0x18] sm:$0xff] }
 0x244   : > { %1049 = vst [vmem:[#allocation8] sm:$0xff] %v1286_v24 }
 0x245   : > { %v1036_v25 = vld [vmem:[#allocation2 + $0x8] sm:$0xff] }
 0x246   : > { %v1287_v26 = vpack.c.bf16 %v1036_v25, %v1035_v23 }
 0x248   : > { %1050 = vst [vmem:[#allocation8 + $0x8] sm:$0xff] %v1287_v26 }
 0x249 PF: > { %p1908_p10 = scmp.eq.s32.totalorder %s1163_s18, 1  ;;  %s1672_s9 = smov [#allocation8]  }
 0x24a   : > { %s1061_s10 = sshll.u32 %s1672_s9, 4  ;;  %s1062_s10 = int_to_ptr.vmem [resolvable:$true] %s1061_s10 }
 0x24b   : > { %s1581_s15 = scalar_lea.vmem %s1062_s10, 256  ;;  %p1588_p6 = scmp.lt.s32.totalorder %s1062_s10, %s1062_s10 }
 0x24c   : > { %p1582_p3 = scmp.ne.s32.totalorder %s1062_s10, %s1581_s15  ;;  %p1589_p8 = scmp.lt.s32.totalorder %s1581_s15, %s1581_s15 }
 0x24e   : > { %p1583_p4 = pnand %p1582_p3, %p1908_p10  ;;  %p1590_p11 = por %p1589_p8, %p1588_p6 }
 0x250   : > { %p1584_p5 = pneg %p1583_p4 }
 0x252   : > { %p1591_p12 = pnand %p1590_p11, %p1584_p5 }
 0x254   : > { %1594 = shalt.err (!%p1591_p12)
}
 0x255   : > { %s1673_s30 = smov 128   ;;  %s1674_s18 = smov 8  }
 0x256   : > { %1293 = dma.vmem_to_hbm [thread:$0]  (%p1908_p10), %s1062_s10, 256, %s1944_s3, [#allocation5], %s1673_s30, %s1673_s30, %s1674_s18  }
 0x257   : > { %1638 = dma.done.wait (%p1908_p10), [#allocation5], 256  }
 0x258   : > { %1640 = vsyncadd (%p1908_p10), [#allocation5], 4294967040 }
 0x259 PF: > { %s20_s17 = sadd.s32 1, %s1663_s17   ;;  %s1950_s12 = smov %s1647_s13 }
 0x25a   : > { %p17_p13 = scmp.ge.s32.totalorder %s20_s17, 4   ;;  %s1951_s13 = smov %s1651_s14 }
 0x25b   : > { %s1952_s14 = smov %s1746_s24  ;;  %s1953_s15 = smov %s1659_s16 }
 0x25c   : > { %s1954_s16 = smov %s1956_s19  ;;  %19 = sbr.rel (!%p17_p13) target bundleno = 7 (0x7), region = 94 }
 0x261   :  { %1077 = vsyncpa [#allocation4], 1 }
 0x262   :  { %1079 = vsyncpa [#allocation4 + $0x1], 1 }
 0x263   :  { %1080 = vsyncpa [#allocation7], 1 }
 0x264   :  { %1082 = vsyncpa [#allocation7 + $0x1], 1 }
 0x265   :  { %1083 = vsyncpa [#allocation5], 1 }
 0x266   :  { %1085 = vsyncpa [#allocation5 + $0x1], 1 }

</bundles_post_ra>
